<compile_context>
chip_gen: v5e
topology: v5e:2x2
jax: 0.10.0
libtpu: 0.0.40
codegen_flags: <defaults>
</compile_context>

<pallas_src>
import functools

import jax
import jax.numpy as jnp
from jax.experimental import pallas as pl
from jax.experimental.pallas import tpu as pltpu

_MIB = 1024 * 1024


def _sublane_multiple(dtype):
    itemsize = jnp.dtype(dtype).itemsize
    if itemsize >= 4:
        return 8
    if itemsize == 2:
        return 16
    return 32


def _gap_kernel(x_ref, o_ref, acc_ref, *, inv_hw, hw, tk, need_k_mask):
    # x_ref:   (TM, TK) tile of the flattened (N*C, H*W) view
    # o_ref:   (TM, 1)  per-row spatial mean (written on the last K step)
    # acc_ref: (TM, 1)  f32 running spatial sum (VMEM scratch, persists over K)
    k = pl.program_id(1)

    @pl.when(k == 0)
    def _():
        acc_ref[...] = jnp.zeros_like(acc_ref)

    x = x_ref[...]
    if need_k_mask:
        # Partial final K tile: zero out lanes past the real H*W extent.
        col = k * tk + jax.lax.broadcasted_iota(jnp.int32, x_ref.shape, 1)
        x = jnp.where(col < hw, x, jnp.zeros_like(x))

    # Cross-lane reduce (XLU). MXU-offload of the final 128-lane sum is a
    # measurement-gated v6e/v7x tweak and intentionally not applied here.
    acc_ref[...] += jnp.sum(x, axis=-1, keepdims=True, dtype=jnp.float32)

    @pl.when(k == pl.num_programs(1) - 1)
    def _():
        o_ref[...] = (acc_ref[...] * inv_hw).astype(o_ref.dtype)


def global_avg_pool2d(x, *, target_block_bytes=8 * _MIB):
    """x: (N, C, H, W) -> (N, C), mean over H and W."""
    N, C, H, W = x.shape
    NC = N * C
    HW = H * W

    # Free reshape: NCHW is contiguous row-major, so (N*C, H*W) is a view.
    x2 = x.reshape(NC, HW)

    itemsize = jnp.dtype(x.dtype).itemsize
    sub = _sublane_multiple(x.dtype)

    # Budget from the *padded* VMEM footprint (lane axis pads to 128).
    padded_hw = pl.cdiv(HW, 128) * 128
    row_bytes = padded_hw * itemsize

    # Keep one block <= ~20 MiB so double-buffering + scratch headroom fits
    # v7x's 64 MiB VMEM per TensorCore (v5e/v6e have 128 MiB).
    max_block_bytes = min(target_block_bytes, 20 * _MIB)

    if row_bytes * sub <= max_block_bytes:
        # ---- Case A: full rows fit; tile only the row axis (no K tiling).
        TK = HW                       # full last dim -> no (.,128) constraint
        padded_tk = padded_hw
        need_k_mask = False

        rows_budget = max(sub, (max_block_bytes // row_bytes) // sub * sub)

        total_padded_bytes = NC * row_bytes
        if total_padded_bytes > 2 * _MIB:
            min_row_steps = 4         # enough data: make the pipeline overlap
        else:
            min_row_steps = 2         # small input: still feed both v7x TCs
        rows_cap = pl.cdiv(pl.cdiv(NC, min_row_steps), sub) * sub

        TM = max(sub, min(rows_budget, rows_cap))
        if TM >= NC:
            TM = NC                   # full-dim block is always legal
    else:
        # ---- Case B: one row exceeds the block budget; K-tile the reduction.
        TM = NC if NC <= sub else sub
        TK = (max_block_bytes // (sub * itemsize)) // 128 * 128
        TK = max(128, min(TK, padded_hw - 128))
        padded_tk = TK
        need_k_mask = (HW % TK) != 0

    GM = pl.cdiv(NC, TM)
    GK = pl.cdiv(HW, TK)

    padded_tm = pl.cdiv(TM, sub) * sub
    block_bytes = padded_tm * padded_tk * itemsize
    vmem_limit_bytes = int(min(48 * _MIB, max(32 * _MIB, 2 * block_bytes + 6 * _MIB)))

    cost = pl.CostEstimate(
        flops=NC * HW,
        transcendentals=0,
        bytes_accessed=NC * HW * itemsize + NC * itemsize,
    )

    out = pl.pallas_call(
        functools.partial(
            _gap_kernel,
            inv_hw=1.0 / HW,
            hw=HW,
            tk=TK,
            need_k_mask=need_k_mask,
        ),
        out_shape=jax.ShapeDtypeStruct((NC, 1), x.dtype),
        grid_spec=pltpu.PrefetchScalarGridSpec(
            num_scalar_prefetch=0,
            grid=(GM, GK),
            in_specs=[pl.BlockSpec((TM, TK), lambda i, k: (i, k))],
            out_specs=pl.BlockSpec((TM, 1), lambda i, k: (i, 0)),
            scratch_shapes=[pltpu.VMEM((TM, 1), jnp.float32)],
        ),
        compiler_params=pltpu.CompilerParams(
            dimension_semantics=("parallel", "arbitrary"),
            vmem_limit_bytes=vmem_limit_bytes,
        ),
        cost_estimate=cost,
    )(x2)

    return out.reshape(N, C)


if __name__ == "__main__":
    key = jax.random.PRNGKey(0)
    # Small NCHW input: batch=2, channels=4, spatial=16x16
    x = jax.random.normal(key, (2, 4, 16, 16), dtype=jnp.float32)

    out = jax.block_until_ready(global_avg_pool2d(x))

    # Reference check against plain JAX (mean over spatial dims)
    ref = jnp.mean(x, axis=(2, 3))
    assert out.shape == (2, 4), out.shape
    assert jnp.allclose(out, ref, atol=1e-5, rtol=1e-5), "mismatch vs reference"

    print("KERNEL_OK")
</pallas_src>

<mosaic_0001>
module attributes {stable_mosaic.version = 11 : i64} {
  func.func @_gap_kernel(%arg0: i32, %arg1: i32, %arg2: memref<8x256xf32, #tpu.memory_space<vmem>>, %arg3: memref<8x1xf32, #tpu.memory_space<vmem>>, %arg4: memref<8x1xf32, #tpu.memory_space<vmem>>) attributes {dimension_semantics = [#tpu.dimension_semantics<parallel>, #tpu.dimension_semantics<arbitrary>], iteration_bounds = array<i64: 1, 1>, scalar_prefetch = 0 : i64, scratch_operands = 1 : i64, tpu.core_type = #tpu.core_type<tc>, window_params = [{transform_indices = @transform_0, window_bounds = array<i64: 8, 256>}, {transform_indices = @transform_1, window_bounds = array<i64: 8, 1>}]} {
    %c0_i32 = arith.constant 0 : i32
    %0 = arith.cmpi eq, %arg1, %c0_i32 : i32
    %1 = arith.extui %0 : i1 to i32
    %c0_i32_0 = arith.constant 0 : i32
    %2 = arith.cmpi ne, %1, %c0_i32_0 : i32
    scf.if %2 {
      %cst_8 = arith.constant 0.000000e+00 : f32
      %12 = vector.broadcast %cst_8 : f32 to vector<8x1xf32>
      %c0_9 = arith.constant 0 : index
      %c0_10 = arith.constant 0 : index
      %13 = vector.load %arg4[%c0_9, %c0_10] : memref<8x1xf32, #tpu.memory_space<vmem>>, vector<8x1xf32>
      tpu.vector_store %arg4[%c0_9, %c0_10], %12 {strides = array<i32>} : memref<8x1xf32, #tpu.memory_space<vmem>>, vector<8x1xf32>,
    } else {
    }
    %c0 = arith.constant 0 : index
    %c0_1 = arith.constant 0 : index
    %3 = vector.load %arg2[%c0, %c0_1] : memref<8x256xf32, #tpu.memory_space<vmem>>, vector<8x256xf32>
    %c0_2 = arith.constant 0 : index
    %c0_3 = arith.constant 0 : index
    %4 = vector.load %arg4[%c0_2, %c0_3] : memref<8x1xf32, #tpu.memory_space<vmem>>, vector<8x1xf32>
    %cst = arith.constant dense<0.000000e+00> : vector<8xf32>
    %5 = vector.multi_reduction <add>, %3, %cst [1] : vector<8x256xf32> to vector<8xf32>
    %6 = vector.shape_cast %5 : vector<8xf32> to vector<8x1xf32>
    %7 = arith.addf %4, %6 : vector<8x1xf32>
    %c0_4 = arith.constant 0 : index
    %c0_5 = arith.constant 0 : index
    %8 = vector.load %arg4[%c0_4, %c0_5] : memref<8x1xf32, #tpu.memory_space<vmem>>, vector<8x1xf32>
    tpu.vector_store %arg4[%c0_4, %c0_5], %7 {strides = array<i32>} : memref<8x1xf32, #tpu.memory_space<vmem>>, vector<8x1xf32>,
    %c0_i32_6 = arith.constant 0 : i32
    %9 = arith.cmpi eq, %arg1, %c0_i32_6 : i32
    %10 = arith.extui %9 : i1 to i32
    %c0_i32_7 = arith.constant 0 : i32
    %11 = arith.cmpi ne, %10, %c0_i32_7 : i32
    scf.if %11 {
      %c0_8 = arith.constant 0 : index
      %c0_9 = arith.constant 0 : index
      %12 = vector.load %arg4[%c0_8, %c0_9] : memref<8x1xf32, #tpu.memory_space<vmem>>, vector<8x1xf32>
      %cst_10 = arith.constant 3.906250e-03 : f32
      %13 = vector.broadcast %cst_10 : f32 to vector<8x1xf32>
      %14 = arith.mulf %12, %13 : vector<8x1xf32>
      %c0_11 = arith.constant 0 : index
      %c0_12 = arith.constant 0 : index
      %15 = vector.load %arg3[%c0_11, %c0_12] : memref<8x1xf32, #tpu.memory_space<vmem>>, vector<8x1xf32>
      tpu.vector_store %arg3[%c0_11, %c0_12], %14 {strides = array<i32>} : memref<8x1xf32, #tpu.memory_space<vmem>>, vector<8x1xf32>,
    } else {
    }
    return
  }
  func.func @transform_0(%arg0: i32, %arg1: i32) -> (i32, i32) {
    %c0_i32 = arith.constant 0 : i32
    return %arg0, %arg1 : i32, i32
  }
  func.func @transform_1(%arg0: i32, %arg1: i32) -> (i32, i32) {
    %c0_i32 = arith.constant 0 : i32
    %c0_i32_0 = arith.constant 0 : i32
    return %arg0, %c0_i32 : i32, i32
  }
}

</mosaic_0001>

<bundles_post_ra>
// kernel: tpu_custom_call.1
= control target key start
LH: loop header
LB: loop body
LE: loop exit
PB: predicated region body
PF: predicated region fallthrough
CT: control target
= control target key end

     0   :  { %6 = vsyncpa [#allocation4], 0  ;;  %s76_s9 = smov [#allocation3]   ;;  %s94_s0 = inlined_call_operand.hbm [shape: f32[8,256], index: 0, kind: input, shape index: {}]   ;;  %s95_s1 = inlined_call_operand.vmem [shape: f32[8,1], index: 1, kind: output, shape index: {}]  }
   0x1   :  { %s12_s8 = sshll.u32 %s94_s0, 4  ;;  %s14_s10 = sshll.u32 %s76_s9, 4  ;;  %s13_s8 = int_to_ptr.hbm [resolvable:$true] %s12_s8  ;;  %s15_s10 = int_to_ptr.vmem [resolvable:$true] %s14_s10 }
   0x2   :  { %17 = dma.hbm_to_vmem [thread:$0]  %s13_s8, 256, %s15_s10, [#allocation4]  }
   0x3   :  { %74 = dma.done.wait [#allocation4], 256  }
   0x4   :  { %75 = vsyncadd [#allocation4], 4294967040  ;;  %vm26_vm0 = vcmask 7168   ;;  %v77_v0 = vmov 0.0   ;;  %v28_v1 = vld [vmem:[#allocation3] sm:$0xff]  ;;  %v29_v2 = vld [vmem:[#allocation3 + $0x8] sm:$0xff] }
   0x5   :  { %27 = vst.msk [vmem:[#allocation2] sm:$0xff] %vm26_vm0, %v77_v0  ;;  %v31_v3 = vadd.f32 %v29_v2, %v28_v1 }
   0x7   :  { %32 = vadd.xlane.f32.xlu0 %v31_v3 }
   0xc   :  { %v30_v4 = vld [vmem:[#allocation2] sm:$0xff] }
  0x7a   :  { %v33_v5 = vpop.xlane.xlu0 %32 }
  0x7b   :  { %v34_v6 = vadd.f32 %v33_v5, %v30_v4 }
  0x7d   :  { %36 = vst.msk [vmem:[#allocation2] sm:$0xff] %vm26_vm0, %v34_v6 }
  0x84   :  { %v40_v7 = vld [vmem:[#allocation2] sm:$0xff] }
  0x85   :  { %v41_v8 = vmul.f32 0.00390625, %v40_v7 }
  0x87   :  { %42 = vst.msk [vmem:[%s95_s1] sm:$0xff] %vm26_vm0, %v41_v8 }
  0x88   :  { %47 = vsyncpa [#allocation4], 1 }

</bundles_post_ra>
